<compile_context>
chip_gen: v7x
topology: tpu7x:2x2x1
jax: 0.10.0
libtpu: 0.0.40
codegen_flags: <defaults>
</compile_context>

<pallas_src>
import jax
import jax.numpy as jnp
from jax.experimental import pallas as pl
from jax.experimental.pallas import tpu as pltpu

HIDDEN = 500        # from nn.Linear(in_att, 500)
HIDDEN_PAD = 512    # zero-padded hidden width: clean (8,128)-aligned MXU tiles
OUT_PAD = 8         # narrow output slab; col 0 = t, col 1 = l, cols 2..7 zero


def attention_mask_kernel(att_ref, w1_ref, b1_ref, w23_ref, b23_ref, out_ref):
    # Stage 1: (tb, in_att) @ (in_att, 512) on the MXU; bias + tanh in f32.
    # Any f32->bf16 narrowing of the operands happens here, in VMEM/vregs,
    # not as an extra HBM pass in the wrapper.
    a = att_ref[...].astype(w1_ref.dtype)
    h = jnp.dot(a, w1_ref[...], preferred_element_type=jnp.float32)
    h = jnp.tanh(h + b1_ref[...])                          # (tb, 512) f32

    # Stage 2: fused two-head projection into a narrow (tb, 8) output.
    w23 = w23_ref[...]                                     # (512, 8)
    out = jnp.dot(h.astype(w23.dtype), w23,
                  preferred_element_type=jnp.float32) + b23_ref[...]
    out_ref[...] = jnp.maximum(out, 0.0)                   # relu; cols 0/1 valid


def _round_up(x, m):
    return ((x + m - 1) // m) * m


def _prepare_params(params, in_att, matmul_dtype):
    """Pad HIDDEN 500->512 and fuse the two heads into one (512, 8) matrix."""
    w1, b1 = params["w1"], params["b1"]      # (in_att,500), (1,500)
    w2, b2 = params["w2"], params["b2"]      # (500,1), (1,1)
    w3, b3 = params["w3"], params["b3"]      # (500,1), (1,1)

    w1_p = jnp.zeros((in_att, HIDDEN_PAD), jnp.float32).at[:, :HIDDEN].set(w1)
    b1_p = jnp.zeros((1, HIDDEN_PAD), jnp.float32).at[:, :HIDDEN].set(b1)

    w23 = jnp.zeros((HIDDEN_PAD, OUT_PAD), jnp.float32)
    w23 = w23.at[:HIDDEN, 0:1].set(w2).at[:HIDDEN, 1:2].set(w3)
    b23 = jnp.zeros((1, OUT_PAD), jnp.float32).at[:, 0:1].set(b2).at[:, 1:2].set(b3)

    # Only the MXU operands get narrowed; biases stay f32 for the VPU/EUP math.
    return w1_p.astype(matmul_dtype), b1_p, w23.astype(matmul_dtype), b23


def _pick_row_tile(B, in_att, max_rows_per_block, vmem_row_budget_bytes):
    """Largest multiple-of-8 row tile within the VMEM budget, with >=2 grid
    steps whenever B > 8 so both v7x TensorCores get work."""
    max_rows_per_block = max(8, (max_rows_per_block // 8) * 8)
    # Per-row VMEM bytes that scale with the tile: double-buffered att + out
    # tiles plus the f32 stage-1 activation.
    per_row = 2 * in_att * 4 + HIDDEN_PAD * 4 + 2 * OUT_PAD * 4
    budget_cap = max(8, (vmem_row_budget_bytes // per_row) // 8 * 8)
    tb = min(max_rows_per_block, _round_up(B, 8), budget_cap)
    if B > 8:
        tb = min(tb, _round_up(pl.cdiv(B, 2), 8))
    return max(8, (tb // 8) * 8)


def _vmem_limit_bytes(tb, in_att, mm_bytes):
    est = (2 * tb * in_att * 4                              # att tile (x2 buf)
           + 2 * tb * OUT_PAD * 4                           # out tile (x2 buf)
           + tb * HIDDEN_PAD * 4                            # stage-1 act (f32)
           + tb * HIDDEN_PAD * mm_bytes                     # stage-2 lhs
           + 2 * (in_att + OUT_PAD) * HIDDEN_PAD * mm_bytes # resident weights
           + 2 * (HIDDEN_PAD + OUT_PAD) * 4)                # biases
    # Keep within all generations' physical VMEM (v7x: 64 MiB per TC).
    return int(min(64 * 2**20, max(32 * 2**20, int(1.5 * est))))


def attention_mask_forward(att, params, *, use_bf16_matmul=False,
                           max_rows_per_block=4096,
                           vmem_row_budget_bytes=24 * 2**20):
    """att: (B, in_att) float32. params: dict with w1,b1,w2,b2,w3,b3.

    Returns (t, l), each (B, 1) float32.
    """
    B, in_att = att.shape
    matmul_dtype = jnp.bfloat16 if use_bf16_matmul else jnp.float32
    mm_bytes = 2 if use_bf16_matmul else 4
    w1_p, b1_p, w23, b23 = _prepare_params(params, in_att, matmul_dtype)

    tb = _pick_row_tile(B, in_att, max_rows_per_block, vmem_row_budget_bytes)
    # Ragged last block is safe: rows are independent, OOB input rows are
    # unspecified garbage whose results never reach HBM (output write clipped).
    grid = (pl.cdiv(B, tb),)

    out = pl.pallas_call(
        attention_mask_kernel,
        out_shape=jax.ShapeDtypeStruct((B, OUT_PAD), jnp.float32),
        grid=grid,
        in_specs=[
            pl.BlockSpec((tb, in_att), lambda i: (i, 0)),            # att tile
            pl.BlockSpec((in_att, HIDDEN_PAD), lambda i: (0, 0)),    # w1 (resident)
            pl.BlockSpec((1, HIDDEN_PAD), lambda i: (0, 0)),         # b1
            pl.BlockSpec((HIDDEN_PAD, OUT_PAD), lambda i: (0, 0)),   # fused w2|w3
            pl.BlockSpec((1, OUT_PAD), lambda i: (0, 0)),            # fused b2|b3
        ],
        out_specs=pl.BlockSpec((tb, OUT_PAD), lambda i: (i, 0)),
        compiler_params=pltpu.CompilerParams(
            dimension_semantics=("parallel",),  # batch splits across v7x's 2 TCs
            vmem_limit_bytes=_vmem_limit_bytes(tb, in_att, mm_bytes)),
    )(att, w1_p, b1_p, w23, b23)

    tl = out[:, :2]            # one contiguous slice of the narrow slab
    return tl[:, 0:1], tl[:, 1:2]


def init_params(key, in_att):
    """Deterministic synthetic parameters matching the PyTorch module shapes."""
    k1, k2, k3, k4, k5, k6 = jax.random.split(key, 6)
    # PyTorch stores Linear weights as (out, in); we keep (in, out) for the kernel.
    w1 = jax.random.normal(k1, (in_att, HIDDEN), jnp.float32) * 0.05
    b1 = jax.random.normal(k2, (1, HIDDEN), jnp.float32) * 0.05
    w2 = jax.random.normal(k3, (HIDDEN, 1), jnp.float32) * 0.05
    b2 = jax.random.normal(k4, (1, 1), jnp.float32) * 0.05
    w3 = jax.random.normal(k5, (HIDDEN, 1), jnp.float32) * 0.05
    b3 = jax.random.normal(k6, (1, 1), jnp.float32) * 0.05
    return {"w1": w1, "b1": b1, "w2": w2, "b2": b2, "w3": w3, "b3": b3}


def reference_forward(att, p):
    h = jnp.tanh(att @ p["w1"] + p["b1"])
    t = jnp.maximum(h @ p["w2"] + p["b2"], 0.0)
    l = jnp.maximum(h @ p["w3"] + p["b3"], 0.0)
    return t, l


if __name__ == "__main__":
    key = jax.random.PRNGKey(0)
    k_att, k_par, k_att2 = jax.random.split(key, 3)

    B, in_att = 8, 32
    att = jax.random.normal(k_att, (B, in_att), jnp.float32)
    params = init_params(k_par, in_att)
    t_ref, l_ref = reference_forward(att, params)

    # f32 MXU path: numerically faithful to the PyTorch forward.
    t, l = attention_mask_forward(att, params)
    jax.block_until_ready((t, l))
    assert t.shape == (B, 1) and l.shape == (B, 1)
    assert jnp.allclose(t, t_ref, atol=1e-5, rtol=1e-5)
    assert jnp.allclose(l, l_ref, atol=1e-5, rtol=1e-5)

    # Ragged batch (not a multiple of 8 or of the row tile) -> multi-step grid,
    # exercises the clipped last block and the >=2-step v7x split.
    B2 = 300
    att2 = jax.random.normal(k_att2, (B2, in_att), jnp.float32)
    t2_ref, l2_ref = reference_forward(att2, params)
    t2, l2 = attention_mask_forward(att2, params)
    jax.block_until_ready((t2, l2))
    assert t2.shape == (B2, 1) and l2.shape == (B2, 1)
    assert jnp.allclose(t2, t2_ref, atol=1e-5, rtol=1e-5)
    assert jnp.allclose(l2, l2_ref, atol=1e-5, rtol=1e-5)

    # bf16-operand MXU path (recommended on v5e/v6e); elementwise math stays f32.
    t_bf, l_bf = attention_mask_forward(att, params, use_bf16_matmul=True)
    jax.block_until_ready((t_bf, l_bf))
    assert jnp.allclose(t_bf, t_ref, atol=5e-2, rtol=5e-2)
    assert jnp.allclose(l_bf, l_ref, atol=5e-2, rtol=5e-2)

    print("KERNEL_OK")
</pallas_src>

<mosaic_0001>
module attributes {stable_mosaic.version = 11 : i64} {
  func.func @attention_mask_kernel(%arg0: i32, %arg1: memref<8x32xf32, #tpu.memory_space<vmem>>, %arg2: memref<32x512xf32, #tpu.memory_space<vmem>>, %arg3: memref<1x512xf32, #tpu.memory_space<vmem>>, %arg4: memref<512x8xf32, #tpu.memory_space<vmem>>, %arg5: memref<1x8xf32, #tpu.memory_space<vmem>>, %arg6: memref<8x8xf32, #tpu.memory_space<vmem>>) attributes {dimension_semantics = [#tpu.dimension_semantics<parallel>], iteration_bounds = array<i64: 1>, scalar_prefetch = 0 : i64, scratch_operands = 0 : i64, tpu.core_type = #tpu.core_type<tc>, window_params = [{transform_indices = @transform_0, window_bounds = array<i64: 8, 32>}, {pipeline_mode = #tpu.pipeline_mode<synchronous>, transform_indices = @transform_1, window_bounds = array<i64: 32, 512>}, {pipeline_mode = #tpu.pipeline_mode<synchronous>, transform_indices = @transform_2, window_bounds = array<i64: 1, 512>}, {pipeline_mode = #tpu.pipeline_mode<synchronous>, transform_indices = @transform_3, window_bounds = array<i64: 512, 8>}, {pipeline_mode = #tpu.pipeline_mode<synchronous>, transform_indices = @transform_4, window_bounds = array<i64: 1, 8>}, {transform_indices = @transform_5, window_bounds = array<i64: 8, 8>}]} {
    %c0 = arith.constant 0 : index
    %c0_0 = arith.constant 0 : index
    %0 = vector.load %arg1[%c0, %c0_0] : memref<8x32xf32, #tpu.memory_space<vmem>>, vector<8x32xf32>
    %c0_1 = arith.constant 0 : index
    %c0_2 = arith.constant 0 : index
    %1 = vector.load %arg2[%c0_1, %c0_2] : memref<32x512xf32, #tpu.memory_space<vmem>>, vector<32x512xf32>
    %cst = arith.constant dense<0.000000e+00> : vector<8x512xf32>
    %2 = tpu.matmul %0, %1, %cst {dimension_numbers = #tpu.dot_dimension_numbers<[1], [0], [0], [1], [0, 0, 1, 1], [], []>} : vector<8x32xf32>, vector<32x512xf32>, vector<8x512xf32> -> vector<8x512xf32>
    %c0_3 = arith.constant 0 : index
    %c0_4 = arith.constant 0 : index
    %3 = vector.load %arg3[%c0_3, %c0_4] : memref<1x512xf32, #tpu.memory_space<vmem>>, vector<1x512xf32>
    %4 = vector.broadcast %3 : vector<1x512xf32> to vector<8x512xf32>
    %5 = arith.addf %2, %4 : vector<8x512xf32>
    %6 = math.tanh %5 : vector<8x512xf32>
    %c0_5 = arith.constant 0 : index
    %c0_6 = arith.constant 0 : index
    %7 = vector.load %arg4[%c0_5, %c0_6] : memref<512x8xf32, #tpu.memory_space<vmem>>, vector<512x8xf32>
    %cst_7 = arith.constant dense<0.000000e+00> : vector<8x8xf32>
    %8 = tpu.matmul %6, %7, %cst_7 {dimension_numbers = #tpu.dot_dimension_numbers<[1], [0], [0], [1], [0, 0, 1, 1], [], []>} : vector<8x512xf32>, vector<512x8xf32>, vector<8x8xf32> -> vector<8x8xf32>
    %c0_8 = arith.constant 0 : index
    %c0_9 = arith.constant 0 : index
    %9 = vector.load %arg5[%c0_8, %c0_9] : memref<1x8xf32, #tpu.memory_space<vmem>>, vector<1x8xf32>
    %10 = vector.broadcast %9 : vector<1x8xf32> to vector<8x8xf32>
    %11 = arith.addf %8, %10 : vector<8x8xf32>
    %cst_10 = arith.constant 0.000000e+00 : f32
    %12 = vector.broadcast %cst_10 : f32 to vector<8x8xf32>
    %13 = arith.maximumf %11, %12 : vector<8x8xf32>
    %c0_11 = arith.constant 0 : index
    %c0_12 = arith.constant 0 : index
    %14 = vector.load %arg6[%c0_11, %c0_12] : memref<8x8xf32, #tpu.memory_space<vmem>>, vector<8x8xf32>
    tpu.vector_store %arg6[%c0_11, %c0_12], %13 {strides = array<i32>} : memref<8x8xf32, #tpu.memory_space<vmem>>, vector<8x8xf32>,
    return
  }
  func.func @transform_0(%arg0: i32) -> (i32, i32) {
    %c0_i32 = arith.constant 0 : i32
    %c0_i32_0 = arith.constant 0 : i32
    return %arg0, %c0_i32 : i32, i32
  }
  func.func @transform_1(%arg0: i32) -> (i32, i32) {
    %c0_i32 = arith.constant 0 : i32
    %c0_i32_0 = arith.constant 0 : i32
    %c0_i32_1 = arith.constant 0 : i32
    return %c0_i32, %c0_i32_0 : i32, i32
  }
  func.func @transform_2(%arg0: i32) -> (i32, i32) {
    %c0_i32 = arith.constant 0 : i32
    %c0_i32_0 = arith.constant 0 : i32
    %c0_i32_1 = arith.constant 0 : i32
    return %c0_i32, %c0_i32_0 : i32, i32
  }
  func.func @transform_3(%arg0: i32) -> (i32, i32) {
    %c0_i32 = arith.constant 0 : i32
    %c0_i32_0 = arith.constant 0 : i32
    %c0_i32_1 = arith.constant 0 : i32
    return %c0_i32, %c0_i32_0 : i32, i32
  }
  func.func @transform_4(%arg0: i32) -> (i32, i32) {
    %c0_i32 = arith.constant 0 : i32
    %c0_i32_0 = arith.constant 0 : i32
    %c0_i32_1 = arith.constant 0 : i32
    return %c0_i32, %c0_i32_0 : i32, i32
  }
  func.func @transform_5(%arg0: i32) -> (i32, i32) {
    %c0_i32 = arith.constant 0 : i32
    %c0_i32_0 = arith.constant 0 : i32
    return %arg0, %c0_i32 : i32, i32
  }
}

</mosaic_0001>

<bundles_post_ra>
// kernel: tpu_custom_call.1
= control target key start
LH: loop header
LB: loop body
LE: loop exit
PB: predicated region body
PF: predicated region fallthrough
CT: control target
= control target key end

     0   :  { %v625_v7 = vmov 0.0   ;;  %vm60_vm0 = vcmask 261120   ;;  %s920_s0 = inlined_call_operand.vmem [shape: f32[8,32], index: 0, kind: input, shape index: {}]   ;;  %s921_s1 = inlined_call_operand.vmem [shape: f32[32,512], index: 1, kind: input, shape index: {}]   ;;  %s922_s2 = inlined_call_operand.vmem [shape: f32[1,512], index: 2, kind: input, shape index: {}]   ;;  %s923_s3 = inlined_call_operand.vmem [shape: f32[512,8], index: 3, kind: input, shape index: {}]   ;;  %s924_s4 = inlined_call_operand.vmem [shape: f32[1,8], index: 4, kind: input, shape index: {}]   ;;  %s925_s5 = inlined_call_operand.hbm [shape: f32[8,8], index: 5, kind: output, shape index: {}]  }
   0x1   :  { %v23_v0 = vld [vmem:[%s921_s1 + $0x8] sm:$0xff]  ;;  %v25_v2 = vld [vmem:[%s921_s1 + $0x18] sm:$0xff]  ;;  %v22_v5 = vld [vmem:[%s921_s1] sm:$0xff]  ;;  %128 = vmatprep.mubr.f32.mxu0 %v625_v7  ;;  %199 = vmatprep.mubr.f32.mxu1 %v625_v7 }
   0x2   :  { %v27_v1 = vld [vmem:[%s921_s1 + $0x28] sm:$0xff]  ;;  %v29_v4 = vld [vmem:[%s921_s1 + $0x38] sm:$0xff]  ;;  %v26_v6 = vld [vmem:[%s921_s1 + $0x20] sm:$0xff] }
   0x3   :  { %v511_v3 = vpack.c.bf16 %v27_v1, %v23_v0  ;;  %v519_v8 = vpack.c.bf16 %v29_v4, %v25_v2  ;;  %v513_v9 = vpack.c.bf16 %v26_v6, %v22_v5  ;;  %v24_v10 = vld [vmem:[%s921_s1 + $0x10] sm:$0xff]  ;;  %v31_v12 = vld [vmem:[%s921_s1 + $0x48] sm:$0xff]  ;;  %v33_v15 = vld [vmem:[%s921_s1 + $0x58] sm:$0xff] }
   0x4   :  { %v28_v11 = vld [vmem:[%s921_s1 + $0x30] sm:$0xff]  ;;  %v35_v14 = vld [vmem:[%s921_s1 + $0x68] sm:$0xff]  ;;  %v37_v16 = vld [vmem:[%s921_s1 + $0x78] sm:$0xff] }
   0x5   :  { %512 = vmatprep.subr.bf16.mxu0 %v511_v3  ;;  %v521_v13 = vpack.c.bf16 %v28_v11, %v24_v10  ;;  %520 = vmatprep.subr.bf16.mxu1 %v519_v8  ;;  %v515_v17 = vpack.c.bf16 %v35_v14, %v31_v12  ;;  %v523_v18 = vpack.c.bf16 %v37_v16, %v33_v15  ;;  %v30_v19 = vld [vmem:[%s921_s1 + $0x40] sm:$0xff]  ;;  %v32_v21 = vld [vmem:[%s921_s1 + $0x50] sm:$0xff]  ;;  %v227_v27 = vld [vmem:[%s923_s3 + $0x88] sm:$0xff] }
   0x6   :  { %514 = vmatpush1.bf16.msra.mxu0 %v513_v9  ;;  %v34_v20 = vld [vmem:[%s921_s1 + $0x60] sm:$0xff]  ;;  %v36_v23 = vld [vmem:[%s921_s1 + $0x70] sm:$0xff]  ;;  %v259_v29 = vld [vmem:[%s923_s3 + $0x188] sm:$0xff] }
   0x7   :  { %522 = vmatpush1.bf16.msra.mxu1 %v521_v13  ;;  %v517_v22 = vpack.c.bf16 %v34_v20, %v30_v19  ;;  %v226_v24 = vld [vmem:[%s923_s3 + $0x80] sm:$0xff]  ;;  %516 = vmatprep.subr.bf16.mxu0 %v515_v17  ;;  %v525_v25 = vpack.c.bf16 %v36_v23, %v32_v21  ;;  %v211_v33 = vld [vmem:[%s923_s3 + $0x8] sm:$0xff]  ;;  %v228_v37 = vld [vmem:[%s923_s3 + $0x90] sm:$0xff] }
   0x8   :  { %524 = vmatprep.subr.bf16.mxu1 %v523_v18  ;;  %v21_v26 = vld [vmem:[%s920_s0] sm:$0xff]  ;;  %v527_v30 = vpack.c.bf16 %v227_v27, %v226_v24  ;;  %v243_v36 = vld [vmem:[%s923_s3 + $0x108] sm:$0xff]  ;;  %v229_v38 = vld [vmem:[%s923_s3 + $0x98] sm:$0xff] }
   0x9   :  { %v258_v28 = vld [vmem:[%s923_s3 + $0x180] sm:$0xff]  ;;  %v531_v40 = vpack.c.bf16 %v229_v38, %v228_v37  ;;  %v260_v41 = vld [vmem:[%s923_s3 + $0x190] sm:$0xff]  ;;  %v261_v42 = vld [vmem:[%s923_s3 + $0x198] sm:$0xff] }
   0xa   :  { %v559_v31 = vpack.c.bf16 %v259_v29, %v258_v28  ;;  %v210_v32 = vld [vmem:[%s923_s3] sm:$0xff]  ;;  %518 = vmatpush1.bf16.msra.mxu0 %v517_v22  ;;  %v212_v43 = vld [vmem:[%s923_s3 + $0x10] sm:$0xff]  ;;  %v563_v44 = vpack.c.bf16 %v261_v42, %v260_v41  ;;  %v213_v45 = vld [vmem:[%s923_s3 + $0x18] sm:$0xff] }
   0xb   :  { %v242_v34 = vld [vmem:[%s923_s3 + $0x100] sm:$0xff]  ;;  %v529_v35 = vpack.c.bf16 %v211_v33, %v210_v32  ;;  %526 = vmatpush1.bf16.msra.mxu1 %v525_v25  ;;  %528 = vmatprep.subr.bf16.mxu0 %v527_v30  ;;  %v244_v46 = vld [vmem:[%s923_s3 + $0x110] sm:$0xff]  ;;  %v245_v47 = vld [vmem:[%s923_s3 + $0x118] sm:$0xff]  ;;  %v533_v51 = vpack.c.bf16 %v213_v45, %v212_v43 }
   0xc   :  { %v561_v39 = vpack.c.bf16 %v243_v36, %v242_v34  ;;  %560 = vmatprep.subr.bf16.mxu1 %v559_v31  ;;  %v230_v48 = vld [vmem:[%s923_s3 + $0xa0] sm:$0xff]  ;;  %v231_v49 = vld [vmem:[%s923_s3 + $0xa8] sm:$0xff]  ;;  %v565_v53 = vpack.c.bf16 %v245_v47, %v244_v46  ;;  %v232_v60 = vld [vmem:[%s923_s3 + $0xb0] sm:$0xff] }
   0xd   :  { %438 = vmatmul.mubr.msk.f32.vlgmr.msra.gmra.mrb[0].mxu0 %vm60_vm0, %v21_v26  ;;  %v262_v50 = vld [vmem:[%s923_s3 + $0x1a0] sm:$0xff]  ;;  %v263_v52 = vld [vmem:[%s923_s3 + $0x1a8] sm:$0xff]  ;;  %v535_v54 = vpack.c.bf16 %v231_v49, %v230_v48  ;;  %v233_v61 = vld [vmem:[%s923_s3 + $0xb8] sm:$0xff] }
   0xe   :  { %439 = vmatmul.mubr.msk.f32.vlgmr.msra.gmra.mrb[0].mxu1 %vm60_vm0, %v21_v26  ;;  %530 = vmatpush3.bf16.msra.mxu0 %v529_v35  ;;  %v214_v55 = vld [vmem:[%s923_s3 + $0x20] sm:$0xff]  ;;  %v215_v56 = vld [vmem:[%s923_s3 + $0x28] sm:$0xff]  ;;  %v567_v58 = vpack.c.bf16 %v263_v52, %v262_v50  ;;  %v264_v62 = vld [vmem:[%s923_s3 + $0x1b0] sm:$0xff] }
   0xf   :  { %562 = vmatpush3.bf16.msra.mxu1 %v561_v39  ;;  %532 = vmatprep.subr.bf16.mxu0 %v531_v40  ;;  %v246_v57 = vld [vmem:[%s923_s3 + $0x120] sm:$0xff]  ;;  %v247_v59 = vld [vmem:[%s923_s3 + $0x128] sm:$0xff]  ;;  %v265_v63 = vld [vmem:[%s923_s3 + $0x1b8] sm:$0xff]  ;;  %v537_v0 = vpack.c.bf16 %v215_v56, %v214_v55 }
  0x10   :  { %564 = vmatprep.subr.bf16.mxu1 %v563_v44 }
  0x12   :  { %534 = vmatpush3.bf16.msra.mxu0 %v533_v51 }
  0x13   :  { %10 = vsyncpa [#allocation3], 0  ;;  %566 = vmatpush3.bf16.msra.mxu1 %v565_v53  ;;  %536 = vmatprep.subr.bf16.mxu0 %v535_v54  ;;  %v569_v1 = vpack.c.bf16 %v247_v59, %v246_v57  ;;  %v539_v2 = vpack.c.bf16 %v233_v61, %v232_v60  ;;  %v216_v3 = vld [vmem:[%s923_s3 + $0x30] sm:$0xff]  ;;  %v217_v4 = vld [vmem:[%s923_s3 + $0x38] sm:$0xff]  ;;  %v571_v5 = vpack.c.bf16 %v265_v63, %v264_v62  ;;  %s626_s22 = smov [#allocation2]   ;;  %vm422_vm1 = vcmask 64512  }
  0x14   :  { %568 = vmatprep.subr.bf16.mxu1 %v567_v58  ;;  %v248_v6 = vld [vmem:[%s923_s3 + $0x130] sm:$0xff]  ;;  %v249_v7 = vld [vmem:[%s923_s3 + $0x138] sm:$0xff]  ;;  %v541_v8 = vpack.c.bf16 %v217_v4, %v216_v3  ;;  %v234_v10 = vld [vmem:[%s923_s3 + $0xc0] sm:$0xff]  ;;  %v40_v58 = vlaneseq  ;;  %s430_s23 = sshll.u32 %s626_s22, 4  ;;  %s431_s23 = int_to_ptr.vmem [resolvable:$true] %s430_s23 }
  0x15   :  { %v573_v9 = vpack.c.bf16 %v249_v7, %v248_v6  ;;  %v235_v11 = vld [vmem:[%s923_s3 + $0xc8] sm:$0xff]  ;;  %v266_v12 = vld [vmem:[%s923_s3 + $0x1c0] sm:$0xff]  ;;  %v236_v22 = vld [vmem:[%s923_s3 + $0xd0] sm:$0xff]  ;;  %s601_s24 = scalar_lea.vmem %s431_s23, 128  ;;  %p606_p1 = scmp.lt.s32.totalorder %s431_s23, %s431_s23 }
  0x16   :  { %538 = vmatpush3.bf16.msra.mxu0 %v537_v0  ;;  %v543_v13 = vpack.c.bf16 %v235_v11, %v234_v10  ;;  %v267_v14 = vld [vmem:[%s923_s3 + $0x1c8] sm:$0xff]  ;;  %v218_v16 = vld [vmem:[%s923_s3 + $0x40] sm:$0xff]  ;;  %v237_v23 = vld [vmem:[%s923_s3 + $0xd8] sm:$0xff]  ;;  %v41_v59 = vshrl.u32 %v40_v58, 7  ;;  %p602_p0 = scmp.ne.s32.totalorder %s431_s23, %s601_s24  ;;  %p607_p2 = scmp.lt.s32.totalorder %s601_s24, %s601_s24 }
  0x17   :  { %570 = vmatpush3.bf16.msra.mxu1 %v569_v1  ;;  %540 = vmatprep.subr.bf16.mxu0 %v539_v2  ;;  %v575_v15 = vpack.c.bf16 %v267_v14, %v266_v12  ;;  %v219_v17 = vld [vmem:[%s923_s3 + $0x48] sm:$0xff]  ;;  %v250_v18 = vld [vmem:[%s923_s3 + $0x140] sm:$0xff]  ;;  %v268_v24 = vld [vmem:[%s923_s3 + $0x1d0] sm:$0xff]  ;;  %v547_v25 = vpack.c.bf16 %v237_v23, %v236_v22 }
  0x18   :  { %572 = vmatprep.subr.bf16.mxu1 %v571_v5  ;;  %v545_v19 = vpack.c.bf16 %v219_v17, %v218_v16  ;;  %v251_v20 = vld [vmem:[%s923_s3 + $0x148] sm:$0xff]  ;;  %v269_v26 = vld [vmem:[%s923_s3 + $0x1d8] sm:$0xff]  ;;  %v220_v27 = vld [vmem:[%s923_s3 + $0x50] sm:$0xff]  ;;  %v42_v60 = vsub.s32 0, %v41_v59  ;;  %v50_v62 = vsub.s32 2, %v41_v59  ;;  %v46_v63 = vsub.s32 1, %v41_v59  ;;  %p608_p3 = por %p607_p2, %p606_p1 }
  0x19   :  { %v577_v21 = vpack.c.bf16 %v251_v20, %v250_v18  ;;  %v221_v28 = vld [vmem:[%s923_s3 + $0x58] sm:$0xff]  ;;  %v579_v29 = vpack.c.bf16 %v269_v26, %v268_v24  ;;  %v252_v31 = vld [vmem:[%s923_s3 + $0x150] sm:$0xff]  ;;  %v238_v34 = vld [vmem:[%s923_s3 + $0xe0] sm:$0xff]  ;;  %v54_v0 = vsub.s32 3, %v41_v59 }
  0x1a   :  { %542 = vmatpush3.bf16.msra.mxu0 %v541_v8  ;;  %v549_v30 = vpack.c.bf16 %v221_v28, %v220_v27  ;;  %v253_v32 = vld [vmem:[%s923_s3 + $0x158] sm:$0xff]  ;;  %v239_v35 = vld [vmem:[%s923_s3 + $0xe8] sm:$0xff]  ;;  %v270_v36 = vld [vmem:[%s923_s3 + $0x1e0] sm:$0xff]  ;;  %p609_p4 = pnand %p608_p3, %p602_p0 }
  0x1b   :  { %574 = vmatpush3.bf16.msra.mxu1 %v573_v9  ;;  %544 = vmatprep.subr.bf16.mxu0 %v543_v13  ;;  %v581_v33 = vpack.c.bf16 %v253_v32, %v252_v31  ;;  %v551_v37 = vpack.c.bf16 %v239_v35, %v238_v34  ;;  %v271_v38 = vld [vmem:[%s923_s3 + $0x1e8] sm:$0xff]  ;;  %v222_v39 = vld [vmem:[%s923_s3 + $0x60] sm:$0xff]  ;;  %v240_v45 = vld [vmem:[%s923_s3 + $0xf0] sm:$0xff] }
  0x1c   :  { %576 = vmatprep.subr.bf16.mxu1 %v575_v15  ;;  %v223_v40 = vld [vmem:[%s923_s3 + $0x68] sm:$0xff]  ;;  %v583_v41 = vpack.c.bf16 %v271_v38, %v270_v36  ;;  %v254_v43 = vld [vmem:[%s923_s3 + $0x160] sm:$0xff]  ;;  %v241_v47 = vld [vmem:[%s923_s3 + $0xf8] sm:$0xff] }
  0x1d   :  { %v553_v42 = vpack.c.bf16 %v223_v40, %v222_v39  ;;  %v255_v44 = vld [vmem:[%s923_s3 + $0x168] sm:$0xff]  ;;  %v272_v48 = vld [vmem:[%s923_s3 + $0x1f0] sm:$0xff]  ;;  %v273_v49 = vld [vmem:[%s923_s3 + $0x1f8] sm:$0xff]  ;;  %v555_v50 = vpack.c.bf16 %v241_v47, %v240_v45 }
  0x1e   :  { %546 = vmatpush3.bf16.msra.mxu0 %v545_v19  ;;  %v585_v46 = vpack.c.bf16 %v255_v44, %v254_v43  ;;  %v587_v51 = vpack.c.bf16 %v273_v49, %v272_v48  ;;  %v224_v52 = vld [vmem:[%s923_s3 + $0x70] sm:$0xff]  ;;  %v225_v53 = vld [vmem:[%s923_s3 + $0x78] sm:$0xff]  ;;  %v38_v61 = vld [vmem:[%s922_s2] sm:$0xf] }
  0x1f   :  { %578 = vmatpush3.bf16.msra.mxu1 %v577_v21  ;;  %548 = vmatprep.subr.bf16.mxu0 %v547_v25  ;;  %v256_v54 = vld [vmem:[%s923_s3 + $0x170] sm:$0xff]  ;;  %v557_v55 = vpack.c.bf16 %v225_v53, %v224_v52  ;;  %v257_v56 = vld [vmem:[%s923_s3 + $0x178] sm:$0xff]  ;;  %v43_v1 = vrot.slane %v38_v61, %v42_v60  ;;  %v51_v2 = vrot.slane %v38_v61, %v50_v62  ;;  %v440_v19 = vld [vmem:[%s924_s4] ss:$0 sm:$0xff] }
  0x20   :  { %580 = vmatprep.subr.bf16.mxu1 %v579_v29  ;;  %v589_v57 = vpack.c.bf16 %v257_v56, %v256_v54  ;;  %v47_v3 = vrot.slane %v38_v61, %v46_v63  ;;  %v55_v4 = vrot.slane %v38_v61, %v54_v0 }
  0x22   :  { %550 = vmatpush3.bf16.msra.mxu0 %v549_v30 }
  0x23   :  { %582 = vmatpush3.bf16.msra.mxu1 %v581_v33  ;;  %552 = vmatprep.subr.bf16.mxu0 %v551_v37 }
  0x24   :  { %584 = vmatprep.subr.bf16.mxu1 %v583_v41 }
  0x26   :  { %554 = vmatpush3.bf16.msra.mxu0 %v553_v42 }
  0x27   :  { %586 = vmatpush3.bf16.msra.mxu1 %v585_v46  ;;  %556 = vmatprep.subr.bf16.mxu0 %v555_v50 }
  0x28   :  { %588 = vmatprep.subr.bf16.mxu1 %v587_v51 }
  0x2a   :  { %558 = vmatpush3.bf16.msra.mxu0 %v557_v55 }
  0x2b   :  { %590 = vmatpush3.bf16.msra.mxu1 %v589_v57 }
  0xe0   :  { %v130_v5 = vpop.f32.mrb[0].mxu0 }
  0xe1   :  { %v131_v6 = vadd.f32 %v130_v5, %v43_v1  ;;  %v201_v7 = vpop.f32.mrb[0].mxu1  ;;  %v132_v8 = vpop.f32.mrb[1].mxu0 }
  0xe2   :  { %v202_v9 = vadd.f32 %v201_v7, %v51_v2  ;;  %v133_v10 = vadd.f32 %v132_v8, %v47_v3  ;;  %v203_v11 = vpop.f32.mrb[1].mxu1 }
  0xe3   :  { %593 = vtanh.f32 %v131_v6  ;;  %v204_v12 = vadd.f32 %v203_v11, %v55_v4 }
  0xe4   :  { %595 = vtanh.f32 %v202_v9 }
  0xe5   :  { %597 = vtanh.f32 %v133_v10 }
  0xe6   :  { %599 = vtanh.f32 %v204_v12 }
  0xed   :  { %v594_v13 = vpop.eup %593 }
  0xee   :  { %v596_v14 = vpop.eup %595 }
  0xef   :  { %v598_v15 = vpop.eup %597 }
  0xf0   :  { %v600_v16 = vpop.eup %599  ;;  %345 = vmatprep.mubr.f32.mxu0 %v598_v15 }
  0xf1   :  { %415 = vmatprep.mubr.f32.mxu1 %v600_v16  ;;  %346 = vmatmul.mubr.f32.vlgmr.msra.gmra.mrb[2].mxu0 %v594_v13 }
  0xf2   :  { %416 = vmatmul.mubr.f32.vlgmr.msra.gmra.mrb[2].mxu1 %v596_v14 }
 0x1c4   :  { %v473_v17 = vpop.f32.mrb[2].mxu0 }
 0x1c5   :  { %v508_v18 = vpop.f32.mrb[2].mxu1  ;;  %v474_v20 = vpop.f32.mrb[3].mxu0 }
 0x1c6   :  { %v475_v21 = vadd.f32 %v474_v20, %v473_v17  ;;  %v509_v22 = vpop.f32.mrb[3].mxu1 }
 0x1c7   :  { %v510_v23 = vadd.f32 %v509_v22, %v508_v18 }
 0x1c8   :  { %v348_v24 = vadd.f32 %v475_v21, %v440_v19 }
 0x1ca   :  { %v418_v25 = vadd.f32 %v510_v23, %v348_v24 }
 0x1cc   :  { %v421_v26 = vmax.f32 %v418_v25, 0.0 }
 0x1ce   :  { %423 = vst.msk [vmem:[#allocation2] sm:$0xff] %vm422_vm1, %v421_v26 }
 0x1cf   :  { %612 = shalt.err (!%p609_p4)
}
 0x1d0   :  { %s613_s26 = scalar_lea.hbm %s925_s5, 128 }
 0x1d1   :  { %p614_p5 = scmp.ne.s32.totalorder %s925_s5, %s613_s26  ;;  %p617_p6 = scmp.lt.u32.totalorder %s613_s26, %s925_s5 }
 0x1d3   :  { %p619_p7 = pnand %p617_p6, %p614_p5 }
 0x1d5   :  { %622 = shalt.err (!%p619_p7)
}
 0x1d6   :  { %433 = dma.vmem_to_hbm [thread:$0]  %s431_s23, 128, %s925_s5, [#allocation3]  }
 0x1d7   :  { %623 = dma.done.wait [#allocation3], 128  }
 0x1d8   :  { %624 = vsyncadd [#allocation3], 4294967168 }
 0x1d9   :  { %437 = vsyncpa [#allocation3], 1 }

</bundles_post_ra>
